<compile_context>
chip_gen: v5e
topology: v5e:2x2
jax: 0.10.0
libtpu: 0.0.40
codegen_flags: <defaults>
</compile_context>

<pallas_src>
import functools

import jax
import jax.numpy as jnp
from jax.experimental import pallas as pl
from jax.experimental.pallas import tpu as pltpu

EPS = 1e-8
_INV_LOG10 = 1.0 / 2.302585092994046  # 1 / ln(10)


def _accumulate(e, o, d_acc, po_acc, pe_acc):
    d_acc[...] += jnp.sum(e * o, axis=-1, keepdims=True)
    po_acc[...] += jnp.sum(o * o, axis=-1, keepdims=True)
    pe_acc[...] += jnp.sum(e * e, axis=-1, keepdims=True)


def _sisnr_kernel(e_ref, o_ref, out_ref, d_acc, po_acc, pe_acc, *,
                  t_total: int, mask_tail: bool):
    k = pl.program_id(1)
    last = pl.num_programs(1) - 1

    @pl.when(k == 0)
    def _init():
        d_acc[...] = jnp.zeros_like(d_acc)
        po_acc[...] = jnp.zeros_like(po_acc)
        pe_acc[...] = jnp.zeros_like(pe_acc)

    e = e_ref[...].astype(jnp.float32)
    o = o_ref[...].astype(jnp.float32)

    if mask_tail:
        # Only the final T block is ragged; keep the hot path select-free.
        @pl.when(k < last)
        def _full_tile():
            _accumulate(e, o, d_acc, po_acc, pe_acc)

        @pl.when(k == last)
        def _ragged_tile():
            t_tile = e.shape[-1]
            col = k * t_tile + jax.lax.broadcasted_iota(jnp.int32, e.shape, 1)
            valid = col < t_total
            # where-select: out-of-bounds lanes may hold NaN/Inf garbage.
            _accumulate(jnp.where(valid, e, 0.0), jnp.where(valid, o, 0.0),
                        d_acc, po_acc, pe_acc)
    else:
        _accumulate(e, o, d_acc, po_acc, pe_acc)

    @pl.when(k == last)
    def _finalize():
        d = d_acc[...]
        po = po_acc[...]
        pe = pe_acc[...]
        # target = (d / (po + EPS)) * o  -> same EPS placement as the reference
        s = d / (po + EPS)
        p_t = s * s * po                      # ||target||^2
        p_n = pe - 2.0 * s * d + p_t          # ||estimated - target||^2
        p_n = jnp.maximum(p_n, 0.0)           # guard f32 cancellation (e ~= target)
        snr = 10.0 * _INV_LOG10 * jnp.log(p_t / (p_n + EPS) + EPS)
        out_ref[...] = snr.astype(out_ref.dtype)


def _round_up(x: int, m: int) -> int:
    return ((x + m - 1) // m) * m


def _vmem_capacity_bytes() -> int:
    """Best-effort per-core VMEM capacity; conservative (v7x) fallback."""
    try:
        info = pltpu.get_tpu_info()
        for name in ("vmem_capacity_bytes", "vmem_bytes", "vmem_size_bytes"):
            cap = getattr(info, name, None)
            if cap:
                return int(cap)
    except Exception:
        pass
    return 64 * 1024 * 1024  # v7x has the smallest VMEM per TensorCore


def sisnr(estimated: jax.Array, original: jax.Array, *,
          block_rows: int | None = None, t_tile: int | None = None) -> jax.Array:
    """SI-SNR per batch row. Returns (B, 1) float32 (keepdim, like the module)."""
    assert estimated.shape == original.shape
    assert estimated.ndim == 2, "kernel expects (B, T); fold leading dims outside"
    assert estimated.dtype == original.dtype
    B, T = estimated.shape
    itemsize = jnp.dtype(estimated.dtype).itemsize

    # Sub-32-bit dtypes pack along sublanes: keep blocks on native-tile rows.
    row_align = {4: 8, 2: 16, 1: 32}.get(itemsize, 8)

    # --- VMEM budget (generation aware) -------------------------------------
    vmem_cap = _vmem_capacity_bytes()
    vmem_limit = min((vmem_cap * 3) // 4, 100 * 1024 * 1024)  # ~48 MiB v7x, ~96 MiB v5e/v6e
    in_budget = max(4 * 1024 * 1024, vmem_limit - 8 * 1024 * 1024)  # headroom

    # --- batch tiling --------------------------------------------------------
    B_al = _round_up(B, row_align)
    br = 256 if block_rows is None else block_rows
    br = min(_round_up(br, row_align), B_al)
    if B_al >= 2 * row_align:
        # Give the "parallel" batch axis >= 2 tiles so both v7x TensorCores
        # get work (harmless on single-core v5e/v6e).
        br = min(br, _round_up((B_al + 1) // 2, row_align))
    # TODO(synk): for B < 2*row_align one v7x core idles; splitting the T
    # reduction across cores would need a second combine pass — not done here.

    # --- time-axis tiling ----------------------------------------------------
    # 2 inputs x 2 pipeline buffers per grid step must fit the input budget;
    # make steps as large as the budget allows so the ~0.35us/step overhead is
    # amortized (the kernel is purely HBM-bound on every generation).
    t_budget = max(128, in_budget // (4 * br * itemsize))
    tt = t_budget if t_tile is None else min(t_tile, t_budget)
    if T <= tt:
        tt = T                      # single reduction step; full-extent block
        mask_tail = False
    else:
        tt = max(128, (tt // 128) * 128)
        mask_tail = (T % tt) != 0   # ragged tail masked in-kernel (no jnp.pad)

    grid = (pl.cdiv(B, br), pl.cdiv(T, tt))

    in_spec = pl.BlockSpec((br, tt), lambda i, k: (i, k))
    # Output block index is constant along k -> stays resident across the
    # reduction and is written once on the final k step.
    out_spec = pl.BlockSpec((br, 1), lambda i, k: (i, 0))

    cost = pl.CostEstimate(
        flops=6 * B * T,
        transcendentals=B,
        bytes_accessed=2 * B * T * itemsize + B * 4,
    )

    kernel = functools.partial(_sisnr_kernel, t_total=T, mask_tail=mask_tail)

    return pl.pallas_call(
        kernel,
        out_shape=jax.ShapeDtypeStruct((B, 1), jnp.float32),
        grid_spec=pltpu.PrefetchScalarGridSpec(
            num_scalar_prefetch=0,
            grid=grid,
            in_specs=[in_spec, in_spec],
            out_specs=out_spec,
            scratch_shapes=[
                pltpu.VMEM((br, 1), jnp.float32),  # sum(e*o)
                pltpu.VMEM((br, 1), jnp.float32),  # sum(o*o)
                pltpu.VMEM((br, 1), jnp.float32),  # sum(e*e)
            ],
        ),
        compiler_params=pltpu.CompilerParams(
            dimension_semantics=("parallel", "arbitrary"),
            vmem_limit_bytes=vmem_limit,
        ),
        cost_estimate=cost,
    )(estimated, original)


def _sisnr_ref(estimated, original):
    """Pure-JAX reference matching the PyTorch module exactly."""
    estimated = estimated.astype(jnp.float32)
    original = original.astype(jnp.float32)
    dot = jnp.sum(estimated * original, axis=-1, keepdims=True)
    p_o = jnp.sum(original * original, axis=-1, keepdims=True)
    target = dot * original / (p_o + EPS)
    noise = estimated - target
    p_t = jnp.sum(target * target, axis=-1, keepdims=True)
    p_n = jnp.sum(noise * noise, axis=-1, keepdims=True)
    return 10.0 * jnp.log10(p_t / (p_n + EPS) + EPS)


if __name__ == "__main__":
    key = jax.random.PRNGKey(0)
    k1, k2, k3, k4, k5, k6 = jax.random.split(key, 6)

    # Case 1: small shapes, defaults -> single reduction step, no masking.
    B, T = 8, 256
    est1 = jax.random.normal(k1, (B, T), dtype=jnp.float32)
    org1 = jax.random.normal(k2, (B, T), dtype=jnp.float32)
    out1 = jax.block_until_ready(sisnr(est1, org1))
    ref1 = _sisnr_ref(est1, org1)
    assert out1.shape == (B, 1)
    assert jnp.allclose(out1, ref1, rtol=1e-4, atol=1e-4), "case 1 mismatch"

    # Case 2: forced T tiling with a ragged tail (5000 % 1024 != 0) and a
    # ragged batch (B=6 inside an 8-row block) -> exercises in-kernel masking
    # and dropped out-of-bounds output writes (no jnp.pad anywhere).
    B2, T2 = 6, 5000
    org2 = jax.random.normal(k3, (B2, T2), dtype=jnp.float32)
    est2 = org2 + 0.3 * jax.random.normal(k4, (B2, T2), dtype=jnp.float32)
    out2 = jax.block_until_ready(sisnr(est2, org2, t_tile=1024))
    ref2 = _sisnr_ref(est2, org2)
    assert out2.shape == (B2, 1)
    assert jnp.allclose(out2, ref2, rtol=1e-4, atol=1e-4), "case 2 mismatch"

    # Case 3: >1 batch tile (feeds both v7x TensorCores) plus auto single-step
    # T reduction with a full-extent (non-128-multiple) lane block.
    B3, T3 = 20, 1000
    org3 = jax.random.normal(k5, (B3, T3), dtype=jnp.float32)
    est3 = org3 + 0.5 * jax.random.normal(k6, (B3, T3), dtype=jnp.float32)
    out3 = jax.block_until_ready(sisnr(est3, org3))
    ref3 = _sisnr_ref(est3, org3)
    assert out3.shape == (B3, 1)
    assert jnp.allclose(out3, ref3, rtol=1e-4, atol=1e-4), "case 3 mismatch"

    # Case 4: bf16 inputs (recommended calling dtype: halves HBM bytes),
    # tiled + masked T, 16-row-aligned blocks, f32 accumulation in-kernel.
    B4, T4 = 4, 3000
    org4 = jax.random.normal(k3, (B4, T4), dtype=jnp.float32).astype(jnp.bfloat16)
    est4 = (org4.astype(jnp.float32)
            + 0.3 * jax.random.normal(k4, (B4, T4), dtype=jnp.float32)
            ).astype(jnp.bfloat16)
    out4 = jax.block_until_ready(sisnr(est4, org4, t_tile=512))
    ref4 = _sisnr_ref(est4, org4)
    assert out4.shape == (B4, 1)
    assert jnp.allclose(out4, ref4, rtol=1e-3, atol=1e-3), "case 4 mismatch"

    print("KERNEL_OK")
</pallas_src>

<mosaic_0001>
module attributes {stable_mosaic.version = 11 : i64} {
  func.func @_sisnr_kernel(%arg0: i32, %arg1: i32, %arg2: memref<8x256xf32, #tpu.memory_space<vmem>>, %arg3: memref<8x256xf32, #tpu.memory_space<vmem>>, %arg4: memref<8x1xf32, #tpu.memory_space<vmem>>, %arg5: memref<8x1xf32, #tpu.memory_space<vmem>>, %arg6: memref<8x1xf32, #tpu.memory_space<vmem>>, %arg7: memref<8x1xf32, #tpu.memory_space<vmem>>) attributes {dimension_semantics = [#tpu.dimension_semantics<parallel>, #tpu.dimension_semantics<arbitrary>], iteration_bounds = array<i64: 1, 1>, scalar_prefetch = 0 : i64, scratch_operands = 3 : i64, tpu.core_type = #tpu.core_type<tc>, window_params = [{transform_indices = @transform_0, window_bounds = array<i64: 8, 256>}, {transform_indices = @transform_1, window_bounds = array<i64: 8, 256>}, {transform_indices = @transform_2, window_bounds = array<i64: 8, 1>}]} {
    %c0_i32 = arith.constant 0 : i32
    %0 = arith.cmpi eq, %arg1, %c0_i32 : i32
    %1 = arith.extui %0 : i1 to i32
    %c0_i32_0 = arith.constant 0 : i32
    %2 = arith.cmpi ne, %1, %c0_i32_0 : i32
    scf.if %2 {
      %cst_20 = arith.constant 0.000000e+00 : f32
      %26 = vector.broadcast %cst_20 : f32 to vector<8x1xf32>
      %c0_21 = arith.constant 0 : index
      %c0_22 = arith.constant 0 : index
      %27 = vector.load %arg5[%c0_21, %c0_22] : memref<8x1xf32, #tpu.memory_space<vmem>>, vector<8x1xf32>
      tpu.vector_store %arg5[%c0_21, %c0_22], %26 {strides = array<i32>} : memref<8x1xf32, #tpu.memory_space<vmem>>, vector<8x1xf32>,
      %cst_23 = arith.constant 0.000000e+00 : f32
      %28 = vector.broadcast %cst_23 : f32 to vector<8x1xf32>
      %c0_24 = arith.constant 0 : index
      %c0_25 = arith.constant 0 : index
      %29 = vector.load %arg6[%c0_24, %c0_25] : memref<8x1xf32, #tpu.memory_space<vmem>>, vector<8x1xf32>
      tpu.vector_store %arg6[%c0_24, %c0_25], %28 {strides = array<i32>} : memref<8x1xf32, #tpu.memory_space<vmem>>, vector<8x1xf32>,
      %cst_26 = arith.constant 0.000000e+00 : f32
      %30 = vector.broadcast %cst_26 : f32 to vector<8x1xf32>
      %c0_27 = arith.constant 0 : index
      %c0_28 = arith.constant 0 : index
      %31 = vector.load %arg7[%c0_27, %c0_28] : memref<8x1xf32, #tpu.memory_space<vmem>>, vector<8x1xf32>
      tpu.vector_store %arg7[%c0_27, %c0_28], %30 {strides = array<i32>} : memref<8x1xf32, #tpu.memory_space<vmem>>, vector<8x1xf32>,
    } else {
    }
    %c0 = arith.constant 0 : index
    %c0_1 = arith.constant 0 : index
    %3 = vector.load %arg2[%c0, %c0_1] : memref<8x256xf32, #tpu.memory_space<vmem>>, vector<8x256xf32>
    %c0_2 = arith.constant 0 : index
    %c0_3 = arith.constant 0 : index
    %4 = vector.load %arg3[%c0_2, %c0_3] : memref<8x256xf32, #tpu.memory_space<vmem>>, vector<8x256xf32>
    %c0_4 = arith.constant 0 : index
    %c0_5 = arith.constant 0 : index
    %5 = vector.load %arg5[%c0_4, %c0_5] : memref<8x1xf32, #tpu.memory_space<vmem>>, vector<8x1xf32>
    %6 = arith.mulf %3, %4 : vector<8x256xf32>
    %cst = arith.constant dense<0.000000e+00> : vector<8xf32>
    %7 = vector.multi_reduction <add>, %6, %cst [1] : vector<8x256xf32> to vector<8xf32>
    %8 = vector.shape_cast %7 : vector<8xf32> to vector<8x1xf32>
    %9 = arith.addf %5, %8 : vector<8x1xf32>
    %c0_6 = arith.constant 0 : index
    %c0_7 = arith.constant 0 : index
    %10 = vector.load %arg5[%c0_6, %c0_7] : memref<8x1xf32, #tpu.memory_space<vmem>>, vector<8x1xf32>
    tpu.vector_store %arg5[%c0_6, %c0_7], %9 {strides = array<i32>} : memref<8x1xf32, #tpu.memory_space<vmem>>, vector<8x1xf32>,
    %c0_8 = arith.constant 0 : index
    %c0_9 = arith.constant 0 : index
    %11 = vector.load %arg6[%c0_8, %c0_9] : memref<8x1xf32, #tpu.memory_space<vmem>>, vector<8x1xf32>
    %12 = arith.mulf %4, %4 : vector<8x256xf32>
    %cst_10 = arith.constant dense<0.000000e+00> : vector<8xf32>
    %13 = vector.multi_reduction <add>, %12, %cst_10 [1] : vector<8x256xf32> to vector<8xf32>
    %14 = vector.shape_cast %13 : vector<8xf32> to vector<8x1xf32>
    %15 = arith.addf %11, %14 : vector<8x1xf32>
    %c0_11 = arith.constant 0 : index
    %c0_12 = arith.constant 0 : index
    %16 = vector.load %arg6[%c0_11, %c0_12] : memref<8x1xf32, #tpu.memory_space<vmem>>, vector<8x1xf32>
    tpu.vector_store %arg6[%c0_11, %c0_12], %15 {strides = array<i32>} : memref<8x1xf32, #tpu.memory_space<vmem>>, vector<8x1xf32>,
    %c0_13 = arith.constant 0 : index
    %c0_14 = arith.constant 0 : index
    %17 = vector.load %arg7[%c0_13, %c0_14] : memref<8x1xf32, #tpu.memory_space<vmem>>, vector<8x1xf32>
    %18 = arith.mulf %3, %3 : vector<8x256xf32>
    %cst_15 = arith.constant dense<0.000000e+00> : vector<8xf32>
    %19 = vector.multi_reduction <add>, %18, %cst_15 [1] : vector<8x256xf32> to vector<8xf32>
    %20 = vector.shape_cast %19 : vector<8xf32> to vector<8x1xf32>
    %21 = arith.addf %17, %20 : vector<8x1xf32>
    %c0_16 = arith.constant 0 : index
    %c0_17 = arith.constant 0 : index
    %22 = vector.load %arg7[%c0_16, %c0_17] : memref<8x1xf32, #tpu.memory_space<vmem>>, vector<8x1xf32>
    tpu.vector_store %arg7[%c0_16, %c0_17], %21 {strides = array<i32>} : memref<8x1xf32, #tpu.memory_space<vmem>>, vector<8x1xf32>,
    %c0_i32_18 = arith.constant 0 : i32
    %23 = arith.cmpi eq, %arg1, %c0_i32_18 : i32
    %24 = arith.extui %23 : i1 to i32
    %c0_i32_19 = arith.constant 0 : i32
    %25 = arith.cmpi ne, %24, %c0_i32_19 : i32
    scf.if %25 {
      %c0_20 = arith.constant 0 : index
      %c0_21 = arith.constant 0 : index
      %26 = vector.load %arg5[%c0_20, %c0_21] : memref<8x1xf32, #tpu.memory_space<vmem>>, vector<8x1xf32>
      %c0_22 = arith.constant 0 : index
      %c0_23 = arith.constant 0 : index
      %27 = vector.load %arg6[%c0_22, %c0_23] : memref<8x1xf32, #tpu.memory_space<vmem>>, vector<8x1xf32>
      %c0_24 = arith.constant 0 : index
      %c0_25 = arith.constant 0 : index
      %28 = vector.load %arg7[%c0_24, %c0_25] : memref<8x1xf32, #tpu.memory_space<vmem>>, vector<8x1xf32>
      %cst_26 = arith.constant 9.99999993E-9 : f32
      %29 = vector.broadcast %cst_26 : f32 to vector<8x1xf32>
      %30 = arith.addf %27, %29 : vector<8x1xf32>
      %31 = arith.divf %26, %30 : vector<8x1xf32>
      %32 = arith.mulf %31, %31 : vector<8x1xf32>
      %33 = arith.mulf %32, %27 : vector<8x1xf32>
      %cst_27 = arith.constant 2.000000e+00 : f32
      %34 = vector.broadcast %cst_27 : f32 to vector<8x1xf32>
      %35 = arith.mulf %34, %31 : vector<8x1xf32>
      %36 = arith.mulf %35, %26 : vector<8x1xf32>
      %37 = arith.subf %28, %36 : vector<8x1xf32>
      %38 = arith.addf %37, %33 : vector<8x1xf32>
      %cst_28 = arith.constant 0.000000e+00 : f32
      %39 = vector.broadcast %cst_28 : f32 to vector<8x1xf32>
      %40 = arith.maximumf %38, %39 : vector<8x1xf32>
      %cst_29 = arith.constant 9.99999993E-9 : f32
      %41 = vector.broadcast %cst_29 : f32 to vector<8x1xf32>
      %42 = arith.addf %40, %41 : vector<8x1xf32>
      %43 = arith.divf %33, %42 : vector<8x1xf32>
      %cst_30 = arith.constant 9.99999993E-9 : f32
      %44 = vector.broadcast %cst_30 : f32 to vector<8x1xf32>
      %45 = arith.addf %43, %44 : vector<8x1xf32>
      %46 = math.log %45 : vector<8x1xf32>
      %cst_31 = arith.constant 4.34294462 : f32
      %47 = vector.broadcast %cst_31 : f32 to vector<8x1xf32>
      %48 = arith.mulf %47, %46 : vector<8x1xf32>
      %c0_32 = arith.constant 0 : index
      %c0_33 = arith.constant 0 : index
      %49 = vector.load %arg4[%c0_32, %c0_33] : memref<8x1xf32, #tpu.memory_space<vmem>>, vector<8x1xf32>
      tpu.vector_store %arg4[%c0_32, %c0_33], %48 {strides = array<i32>} : memref<8x1xf32, #tpu.memory_space<vmem>>, vector<8x1xf32>,
    } else {
    }
    return
  }
  func.func @transform_0(%arg0: i32, %arg1: i32) -> (i32, i32) {
    %c0_i32 = arith.constant 0 : i32
    return %arg0, %arg1 : i32, i32
  }
  func.func @transform_1(%arg0: i32, %arg1: i32) -> (i32, i32) {
    %c0_i32 = arith.constant 0 : i32
    return %arg0, %arg1 : i32, i32
  }
  func.func @transform_2(%arg0: i32, %arg1: i32) -> (i32, i32) {
    %c0_i32 = arith.constant 0 : i32
    %c0_i32_0 = arith.constant 0 : i32
    return %arg0, %c0_i32 : i32, i32
  }
}

</mosaic_0001>

<bundles_post_ra>
// kernel: tpu_custom_call.1
= control target key start
LH: loop header
LB: loop body
LE: loop exit
PB: predicated region body
PF: predicated region fallthrough
CT: control target
= control target key end

     0   :  { %7 = vsyncpa [#allocation6], 0  ;;  %s227_s0 = inlined_call_operand.hbm [shape: f32[8,256], index: 0, kind: input, shape index: {}]   ;;  %s228_s1 = inlined_call_operand.hbm [shape: f32[8,256], index: 1, kind: input, shape index: {}]   ;;  %s229_s2 = inlined_call_operand.vmem [shape: f32[8,1], index: 2, kind: output, shape index: {}]  }
   0x1   :  { %s14_s11 = sshll.u32 %s227_s0, 4  ;;  %s15_s11 = int_to_ptr.hbm [resolvable:$true] %s14_s11 }
   0x2   :  { %8 = vsyncpa [#allocation8], 0  ;;  %s193_s12 = smov [#allocation5]   ;;  %s25_s16 = sshll.u32 %s228_s1, 4  ;;  %s26_s16 = int_to_ptr.hbm [resolvable:$true] %s25_s16 }
   0x3   :  { %s16_s13 = sshll.u32 %s193_s12, 4  ;;  %s194_s17 = smov [#allocation7]   ;;  %s17_s13 = int_to_ptr.vmem [resolvable:$true] %s16_s13 }
   0x4   :  { %19 = dma.hbm_to_vmem [thread:$0]  %s15_s11, 256, %s17_s13, [#allocation6]  }
   0x5   :  { %s27_s18 = sshll.u32 %s194_s17, 4  ;;  %s28_s18 = int_to_ptr.vmem [resolvable:$true] %s27_s18 }
   0x6   :  { %30 = dma.hbm_to_vmem [thread:$0]  %s26_s16, 256, %s28_s18, [#allocation8]  }
   0x7   :  { %189 = dma.done.wait [#allocation6], 256  }
   0x8   :  { %190 = vsyncadd [#allocation6], 4294967040 }
   0x9   :  { %191 = dma.done.wait [#allocation8], 256  }
   0xa   :  { %192 = vsyncadd [#allocation8], 4294967040  ;;  %vm43_vm0 = vcmask 7168   ;;  %v195_v0 = vmov 0.0   ;;  %v49_v1 = vld [vmem:[#allocation7] sm:$0xff]  ;;  %v50_v2 = vld [vmem:[#allocation7 + $0x8] sm:$0xff] }
   0xb   :  { %45 = vst.msk [vmem:[#allocation3] sm:$0xff] %vm43_vm0, %v195_v0  ;;  %v47_v3 = vld [vmem:[#allocation5] sm:$0xff]  ;;  %v61_v4 = vmul.f32 %v49_v1, %v49_v1  ;;  %v62_v5 = vmul.f32 %v50_v2, %v50_v2  ;;  %v48_v6 = vld [vmem:[#allocation5 + $0x8] sm:$0xff] }
   0xc   :  { %44 = vst.msk [vmem:[#allocation2] sm:$0xff] %vm43_vm0, %v195_v0  ;;  %v69_v7 = vmul.f32 %v47_v3, %v47_v3  ;;  %v70_v8 = vmul.f32 %v48_v6, %v48_v6  ;;  %v52_v11 = vmul.f32 %v49_v1, %v47_v3  ;;  %v53_v12 = vmul.f32 %v50_v2, %v48_v6 }
   0xd   :  { %46 = vst.msk [vmem:[#allocation4] sm:$0xff] %vm43_vm0, %v195_v0  ;;  %v63_v9 = vadd.f32 %v62_v5, %v61_v4 }
   0xe   :  { %v71_v10 = vadd.f32 %v70_v8, %v69_v7  ;;  %v54_v13 = vadd.f32 %v53_v12, %v52_v11 }
   0xf   :  { %64 = vadd.xlane.f32.xlu0 %v63_v9 }
  0x10   :  { %72 = vadd.xlane.f32.xlu1 %v71_v10 }
  0x12   :  { %v60_v14 = vld [vmem:[#allocation3] sm:$0xff] }
  0x13   :  { %v51_v20 = vld [vmem:[#allocation2] sm:$0xff] }
  0x14   :  { %v68_v15 = vld [vmem:[#allocation4] sm:$0xff] }
  0x17   :  { %55 = vadd.xlane.f32.xlu0 %v54_v13 }
  0x82   :  { %v65_v16 = vpop.xlane.xlu0 %64 }
  0x83   :  { %v66_v17 = vadd.f32 %v65_v16, %v60_v14  ;;  %v73_v18 = vpop.xlane.xlu1 %72 }
  0x84   :  { %v74_v19 = vadd.f32 %v73_v18, %v68_v15 }
  0x85   :  { %67 = vst.msk [vmem:[#allocation3] sm:$0xff] %vm43_vm0, %v66_v17 }
  0x86   :  { %75 = vst.msk [vmem:[#allocation4] sm:$0xff] %vm43_vm0, %v74_v19 }
  0x8a   :  { %v56_v21 = vpop.xlane.xlu0 %55 }
  0x8b   :  { %v57_v22 = vadd.f32 %v56_v21, %v51_v20 }
  0x8c   :  { %v80_v23 = vld [vmem:[#allocation3] sm:$0xff] }
  0x8d   :  { %v82_v24 = vadd.f32 1e-08, %v80_v23  ;;  %59 = vst.msk [vmem:[#allocation2] sm:$0xff] %vm43_vm0, %v57_v22  ;;  %v81_v39 = vld [vmem:[#allocation4] sm:$0xff] }
  0x8f   :  { %135 = vrcp.f32 %v82_v24  ;;  %v94_v28 = vand.u32 2147483648, %v82_v24  ;;  %v92_v30 = vand.u32 2147483647, %v82_v24  ;;  %vm88_vm2 = vweird.f32 %v82_v24 }
  0x91   :  { %v95_v33 = vor.u32 1.1754944e-38, %v94_v28  ;;  %vm93_vm4 = vcmp.eq.f32.partialorder %v92_v30, 8.507059e+37 }
  0x94   :  { %v79_v32 = vld [vmem:[#allocation2] sm:$0xff] }
  0x95   :  { %v136_v25 = vpop.eup %135 }
  0x96   :  { %v84_v26 = vmul.f32 %v136_v25, %v82_v24  ;;  %vm89_vm1 = vweird.f32 %v136_v25 }
  0x97   :  { %vm90_vm3 = vmor %vm88_vm2, %vm89_vm1 }
  0x98   :  { %v85_v27 = vsub.f32 1.0, %v84_v26 }
  0x9a   :  { %v86_v29 = vmul.f32 %v136_v25, %v85_v27 }
  0x9c   :  { %v87_v31 = vadd.f32 %v136_v25, %v86_v29 }
  0x9e   :  { %v91_v34 = vsel %vm90_vm3, %v136_v25, %v87_v31 }
  0x9f   :  { %v96_v35 = vsel %vm93_vm4, %v95_v33, %v91_v34 }
  0xa0   :  { %v97_v36 = vmul.f32 %v96_v35, %v79_v32 }
  0xa2   :  { %v98_v37 = vmul.f32 %v97_v36, %v97_v36  ;;  %v100_v38 = vmul.f32 2.0, %v97_v36 }
  0xa4   :  { %v101_v40 = vmul.f32 %v100_v38, %v79_v32  ;;  %v99_v41 = vmul.f32 %v98_v37, %v80_v23 }
  0xa6   :  { %v102_v42 = vsub.f32 %v81_v39, %v101_v40 }
  0xa8   :  { %v103_v43 = vadd.f32 %v102_v42, %v99_v41 }
  0xaa   :  { %v104_v44 = vmax.f32 %v103_v43, 0.0 }
  0xac   :  { %v105_v45 = vadd.f32 1e-08, %v104_v44 }
  0xae   :  { %137 = vrcp.f32 %v105_v45  ;;  %v117_v49 = vand.u32 2147483648, %v105_v45  ;;  %v115_v51 = vand.u32 2147483647, %v105_v45  ;;  %vm111_vm6 = vweird.f32 %v105_v45 }
  0xb0   :  { %v118_v53 = vor.u32 1.1754944e-38, %v117_v49  ;;  %vm116_vm8 = vcmp.eq.f32.partialorder %v115_v51, 8.507059e+37 }
  0xb4   :  { %v138_v46 = vpop.eup %137 }
  0xb5   :  { %v107_v47 = vmul.f32 %v138_v46, %v105_v45  ;;  %vm112_vm5 = vweird.f32 %v138_v46 }
  0xb6   :  { %vm113_vm7 = vmor %vm111_vm6, %vm112_vm5 }
  0xb7   :  { %v108_v48 = vsub.f32 1.0, %v107_v47 }
  0xb9   :  { %v109_v50 = vmul.f32 %v138_v46, %v108_v48 }
  0xbb   :  { %v110_v52 = vadd.f32 %v138_v46, %v109_v50 }
  0xbd   :  { %v114_v54 = vsel %vm113_vm7, %v138_v46, %v110_v52 }
  0xbe   :  { %v119_v55 = vsel %vm116_vm8, %v118_v53, %v114_v54 }
  0xbf   :  { %v120_v56 = vmul.f32 %v119_v55, %v99_v41 }
  0xc1   :  { %v121_v57 = vadd.f32 1e-08, %v120_v56 }
  0xc3   :  { %139 = vlog2.f32 %v121_v57 }
  0xc9   :  { %v140_v58 = vpop.eup %139 }
  0xca   :  { %v123_v59 = vmul.f32 0.6931472, %v140_v58 }
  0xcc   :  { %v124_v60 = vmul.f32 4.3429446, %v123_v59 }
  0xce   :  { %125 = vst.msk [vmem:[%s229_s2] sm:$0xff] %vm43_vm0, %v124_v60 }
  0xcf   :  { %130 = vsyncpa [#allocation6], 1 }
  0xd0   :  { %131 = vsyncpa [#allocation8], 1 }

</bundles_post_ra>
